<compile_context>
chip_gen: v6e
topology: v6e:2x2x1
jax: 0.10.0
libtpu: 0.0.40
codegen_flags: <defaults>
</compile_context>

<pallas_src>
import math
from functools import partial

import numpy as np
import jax
import jax.numpy as jnp
from jax.experimental import pallas as pl
from jax.experimental.pallas import tpu as pltpu


def _patch_embed_kernel(patches_ref, w_ref, params_ref, out_ref, *, eps):
    # Conv-as-matmul on the MXU; accumulate in f32.
    acc = jnp.dot(patches_ref[...], w_ref[...], preferred_element_type=jnp.float32)
    bias = params_ref[0:1, :]          # (1, E), f32
    gamma = params_ref[1:2, :]
    beta = params_ref[2:3, :]
    acc = acc + bias                   # (TM, E)

    # LayerNorm over the real (un-padded) embed axis, biased variance, all f32.
    inv_e = 1.0 / float(acc.shape[-1])
    mean = jnp.sum(acc, axis=-1, keepdims=True) * inv_e
    xc = acc - mean
    var = jnp.sum(xc * xc, axis=-1, keepdims=True) * inv_e
    xn = xc * jax.lax.rsqrt(var + eps)
    out_ref[...] = (xn * gamma + beta).astype(out_ref.dtype)


def _pick_row_tile(n_rows, max_tm=1024):
    """Row tile: >= 2 grid steps when possible (v7x megacore), multiple of 8 sublanes,
    256-aligned when large, capped at max_tm (v5e/v6e overhead amortization)."""
    if n_rows < 8:
        return n_rows                      # block == full dim (always legal)
    half = -(-n_rows // 2)                 # ceil(n_rows / 2) -> guarantees >= 2 steps
    tm = -(-half // 8) * 8                 # round up to sublane multiple
    if tm >= 256:
        tm = -(-tm // 256) * 256           # clean full-height MXU passes
    return min(max_tm, tm)


def overlap_patch_embed(x, conv_w, conv_b, ln_w, ln_b, *, stride, eps=1e-5,
                        max_row_tile=1024, compute_dtype=jnp.bfloat16, out_dtype=None):
    """x: (B, C, H, W) NCHW, conv_w: (E, C, kh, kw) OIHW. Returns (out, H_out, W_out),
    out has shape (B, H_out*W_out, E) -- same as the PyTorch module's forward."""
    B, C, H, W = x.shape
    E, _, kh, kw = conv_w.shape
    ph, pw = kh // 2, kw // 2
    H_out = (H + 2 * ph - kh) // stride + 1
    W_out = (W + 2 * pw - kw) // stride + 1
    K = kh * kw * C
    R = B * H_out * W_out
    out_dtype = x.dtype if out_dtype is None else out_dtype

    # --- im2col glue (deferred-fusion path): one small NHWC copy/cast of x, then the
    #     (R, K) patch matrix is produced directly in its final row-major layout and
    #     already in the streamed compute dtype (no transpose of the big intermediate).
    x_nhwc = jnp.transpose(x, (0, 2, 3, 1)).astype(compute_dtype)
    x_pad = jnp.pad(x_nhwc, ((0, 0), (ph, ph), (pw, pw), (0, 0)))
    cols = []
    for ki in range(kh):
        for kj in range(kw):
            cols.append(x_pad[:, ki:ki + stride * H_out:stride,
                                 kj:kj + stride * W_out:stride, :])
    patches = jnp.concatenate(cols, axis=-1).reshape(R, K)     # order (ki, kj, c)

    # Flattened conv weight in matching (ki, kj, c) row order; small resident operands.
    w_flat = conv_w.transpose(2, 3, 1, 0).reshape(K, E).astype(compute_dtype)
    params = jnp.stack([conv_b, ln_w, ln_b], axis=0).astype(jnp.float32)   # (3, E)

    tm = _pick_row_tile(R, max_row_tile)
    n_steps = pl.cdiv(R, tm)
    patches_spec = pl.BlockSpec(
        (tm, K), lambda i: (i, 0),
        pipeline_mode=pl.Buffered(3) if n_steps >= 3 else None)

    cost = pl.CostEstimate(
        flops=2 * R * K * E,
        transcendentals=R,                                     # one rsqrt per row
        bytes_accessed=(patches.size * patches.dtype.itemsize
                        + w_flat.size * w_flat.dtype.itemsize
                        + params.size * 4
                        + R * E * np.dtype(out_dtype).itemsize))

    out = pl.pallas_call(
        partial(_patch_embed_kernel, eps=eps),
        out_shape=jax.ShapeDtypeStruct((R, E), out_dtype),
        grid_spec=pl.GridSpec(
            grid=(n_steps,),
            in_specs=[
                patches_spec,                               # streamed patch rows
                pl.BlockSpec((K, E), lambda i: (0, 0)),     # resident conv weight
                pl.BlockSpec((3, E), lambda i: (0, 0)),     # resident bias/gamma/beta
            ],
            out_specs=pl.BlockSpec((tm, E), lambda i: (i, 0)),
        ),
        compiler_params=pltpu.CompilerParams(
            dimension_semantics=("parallel",)),
        cost_estimate=cost,
    )(patches, w_flat, params)

    # Free contiguous reshape: output already has the real R rows and E columns.
    return out.reshape(B, H_out * W_out, E), H_out, W_out


def _reference(x, conv_w, conv_b, ln_w, ln_b, *, stride, eps=1e-5):
    kh, kw = conv_w.shape[2], conv_w.shape[3]
    ph, pw = kh // 2, kw // 2
    y = jax.lax.conv_general_dilated(
        x, conv_w, (stride, stride), ((ph, ph), (pw, pw)),
        dimension_numbers=("NCHW", "OIHW", "NCHW"))
    y = y + conv_b[None, :, None, None]
    B, E, Ho, Wo = y.shape
    y = y.reshape(B, E, Ho * Wo).transpose(0, 2, 1)
    mean = y.mean(-1, keepdims=True)
    var = y.var(-1, keepdims=True)
    yn = (y - mean) / jnp.sqrt(var + eps) * ln_w + ln_b
    return yn, Ho, Wo


if __name__ == "__main__":
    def _run_case(key, *, B, C, H, W, patch, stride, E, random_affine):
        kx, kw_, kb, kg, kbt = jax.random.split(key, 5)
        x = jax.random.normal(kx, (B, C, H, W), dtype=jnp.float32)
        fan_out = patch * patch * E                      # groups == 1
        conv_w = jax.random.normal(kw_, (E, C, patch, patch),
                                   dtype=jnp.float32) * math.sqrt(2.0 / fan_out)
        if random_affine:
            conv_b = 0.1 * jax.random.normal(kb, (E,), dtype=jnp.float32)
            ln_w = 1.0 + 0.1 * jax.random.normal(kg, (E,), dtype=jnp.float32)
            ln_b = 0.1 * jax.random.normal(kbt, (E,), dtype=jnp.float32)
        else:                                            # mirrors _init_weights
            conv_b = jnp.zeros((E,), dtype=jnp.float32)
            ln_w = jnp.ones((E,), dtype=jnp.float32)
            ln_b = jnp.zeros((E,), dtype=jnp.float32)

        ref, Ho_r, Wo_r = _reference(x, conv_w, conv_b, ln_w, ln_b, stride=stride)

        # 1) Exact-math path (f32 streamed operands): tight check vs f32 reference.
        out32, Ho, Wo = overlap_patch_embed(x, conv_w, conv_b, ln_w, ln_b,
                                            stride=stride, compute_dtype=jnp.float32)
        out32 = jax.block_until_ready(out32)
        assert (Ho, Wo) == (Ho_r, Wo_r)
        assert out32.shape == (B, Ho * Wo, E)
        assert jnp.allclose(out32, ref, atol=1e-4, rtol=1e-4)

        # 2) Performance path (bf16 streamed operands, f32 accumulate / LN math).
        out, Ho, Wo = overlap_patch_embed(x, conv_w, conv_b, ln_w, ln_b, stride=stride)
        out = jax.block_until_ready(out)
        assert (Ho, Wo) == (Ho_r, Wo_r)
        assert out.shape == (B, Ho * Wo, E)
        assert jnp.allclose(out, ref, atol=5e-2, rtol=5e-2)

    key = jax.random.PRNGKey(0)
    k1, k2 = jax.random.split(key)
    # Default OverlapPatchEmbed geometry (patch 7 / stride 4) at small scale.
    _run_case(k1, B=2, C=4, H=16, W=16, patch=7, stride=4, E=32, random_affine=False)
    # NetG's patch_embed3/4 geometry (patch 3 / stride 2): uneven row tiling
    # (R=72, tile=40) and a non-multiple-of-128 embed width.
    _run_case(k2, B=2, C=8, H=12, W=12, patch=3, stride=2, E=40, random_affine=True)

    print("KERNEL_OK")
</pallas_src>

<mosaic_0001>
module attributes {stable_mosaic.version = 11 : i64} {
  func.func @_patch_embed_kernel(%arg0: i32, %arg1: memref<16x196xf32, #tpu.memory_space<vmem>>, %arg2: memref<196x32xf32, #tpu.memory_space<vmem>>, %arg3: memref<3x32xf32, #tpu.memory_space<vmem>>, %arg4: memref<16x32xf32, #tpu.memory_space<vmem>>) attributes {dimension_semantics = [#tpu.dimension_semantics<parallel>], iteration_bounds = array<i64: 2>, scalar_prefetch = 0 : i64, scratch_operands = 0 : i64, tpu.core_type = #tpu.core_type<tc>, window_params = [{transform_indices = @transform_0, window_bounds = array<i64: 16, 196>}, {pipeline_mode = #tpu.pipeline_mode<synchronous>, transform_indices = @transform_1, window_bounds = array<i64: 196, 32>}, {pipeline_mode = #tpu.pipeline_mode<synchronous>, transform_indices = @transform_2, window_bounds = array<i64: 3, 32>}, {transform_indices = @transform_3, window_bounds = array<i64: 16, 32>}]} {
    %c0 = arith.constant 0 : index
    %c0_0 = arith.constant 0 : index
    %0 = vector.load %arg1[%c0, %c0_0] : memref<16x196xf32, #tpu.memory_space<vmem>>, vector<16x196xf32>
    %c0_1 = arith.constant 0 : index
    %c0_2 = arith.constant 0 : index
    %1 = vector.load %arg2[%c0_1, %c0_2] : memref<196x32xf32, #tpu.memory_space<vmem>>, vector<196x32xf32>
    %cst = arith.constant dense<0.000000e+00> : vector<16x32xf32>
    %2 = tpu.matmul %0, %1, %cst {dimension_numbers = #tpu.dot_dimension_numbers<[1], [0], [0], [1], [0, 0, 1, 1], [], []>} : vector<16x196xf32>, vector<196x32xf32>, vector<16x32xf32> -> vector<16x32xf32>
    %c0_3 = arith.constant 0 : index
    %c0_4 = arith.constant 0 : index
    %3 = vector.load %arg3[%c0_3, %c0_4] : memref<3x32xf32, #tpu.memory_space<vmem>>, vector<1x32xf32>
    %c1 = arith.constant 1 : index
    %c0_5 = arith.constant 0 : index
    %4 = vector.load %arg3[%c1, %c0_5] : memref<3x32xf32, #tpu.memory_space<vmem>>, vector<1x32xf32>
    %c2 = arith.constant 2 : index
    %c0_6 = arith.constant 0 : index
    %5 = vector.load %arg3[%c2, %c0_6] : memref<3x32xf32, #tpu.memory_space<vmem>>, vector<1x32xf32>
    %6 = vector.broadcast %3 : vector<1x32xf32> to vector<16x32xf32>
    %7 = arith.addf %2, %6 : vector<16x32xf32>
    %cst_7 = arith.constant dense<0.000000e+00> : vector<16xf32>
    %8 = vector.multi_reduction <add>, %7, %cst_7 [1] : vector<16x32xf32> to vector<16xf32>
    %9 = vector.shape_cast %8 : vector<16xf32> to vector<16x1xf32>
    %cst_8 = arith.constant 3.125000e-02 : f32
    %10 = vector.broadcast %cst_8 : f32 to vector<16x1xf32>
    %11 = arith.mulf %9, %10 : vector<16x1xf32>
    %12 = vector.broadcast %11 : vector<16x1xf32> to vector<16x32xf32>
    %13 = arith.subf %7, %12 : vector<16x32xf32>
    %14 = arith.mulf %13, %13 : vector<16x32xf32>
    %cst_9 = arith.constant dense<0.000000e+00> : vector<16xf32>
    %15 = vector.multi_reduction <add>, %14, %cst_9 [1] : vector<16x32xf32> to vector<16xf32>
    %16 = vector.shape_cast %15 : vector<16xf32> to vector<16x1xf32>
    %cst_10 = arith.constant 3.125000e-02 : f32
    %17 = vector.broadcast %cst_10 : f32 to vector<16x1xf32>
    %18 = arith.mulf %16, %17 : vector<16x1xf32>
    %cst_11 = arith.constant 9.99999974E-6 : f32
    %19 = vector.broadcast %cst_11 : f32 to vector<16x1xf32>
    %20 = arith.addf %18, %19 : vector<16x1xf32>
    %21 = math.rsqrt %20 : vector<16x1xf32>
    %22 = vector.broadcast %21 : vector<16x1xf32> to vector<16x32xf32>
    %23 = arith.mulf %13, %22 : vector<16x32xf32>
    %24 = vector.broadcast %4 : vector<1x32xf32> to vector<16x32xf32>
    %25 = arith.mulf %23, %24 : vector<16x32xf32>
    %26 = vector.broadcast %5 : vector<1x32xf32> to vector<16x32xf32>
    %27 = arith.addf %25, %26 : vector<16x32xf32>
    %c0_12 = arith.constant 0 : index
    %c0_13 = arith.constant 0 : index
    %28 = vector.load %arg4[%c0_12, %c0_13] : memref<16x32xf32, #tpu.memory_space<vmem>>, vector<16x32xf32>
    tpu.vector_store %arg4[%c0_12, %c0_13], %27 {strides = array<i32>} : memref<16x32xf32, #tpu.memory_space<vmem>>, vector<16x32xf32>,
    return
  }
  func.func @transform_0(%arg0: i32) -> (i32, i32) {
    %c0_i32 = arith.constant 0 : i32
    %c0_i32_0 = arith.constant 0 : i32
    return %arg0, %c0_i32 : i32, i32
  }
  func.func @transform_1(%arg0: i32) -> (i32, i32) {
    %c0_i32 = arith.constant 0 : i32
    %c0_i32_0 = arith.constant 0 : i32
    %c0_i32_1 = arith.constant 0 : i32
    return %c0_i32, %c0_i32_0 : i32, i32
  }
  func.func @transform_2(%arg0: i32) -> (i32, i32) {
    %c0_i32 = arith.constant 0 : i32
    %c0_i32_0 = arith.constant 0 : i32
    %c0_i32_1 = arith.constant 0 : i32
    return %c0_i32, %c0_i32_0 : i32, i32
  }
  func.func @transform_3(%arg0: i32) -> (i32, i32) {
    %c0_i32 = arith.constant 0 : i32
    %c0_i32_0 = arith.constant 0 : i32
    return %arg0, %c0_i32 : i32, i32
  }
}

</mosaic_0001>

<bundles_post_ra>
// kernel: tpu_custom_call.1
= control target key start
LH: loop header
LB: loop body
LE: loop exit
PB: predicated region body
PF: predicated region fallthrough
CT: control target
= control target key end

     0   :  { %8 = vsyncpa [#allocation3], 0  ;;  %s858_s0 = inlined_call_operand.vmem [shape: f32[32,196], index: 0, kind: input, shape index: {}]   ;;  %s859_s1 = inlined_call_operand.vmem [shape: f32[196,32], index: 1, kind: input, shape index: {}]   ;;  %s860_s2 = inlined_call_operand.vmem [shape: f32[3,32], index: 2, kind: input, shape index: {}]   ;;  %s861_s3 = inlined_call_operand.hbm [shape: f32[32,32], index: 3, kind: output, shape index: {}]  }
   0x1   :  { %10 = vsyncpa [#allocation3 + $0x1], 0  ;;  %s617_s12 = smov 0   ;;  %s619_s13 = smov 0  }
   0x2   :  { %s621_s14 = smov 0   ;;  %s623_s15 = smov 0  }
   0x3 LB: > { %s638_s16 = sadd.s32 4294967295, %s591_s15   ;;  %s414_s17 = sadd.s32 4294967294, %s591_s15   ;;  %s591_s15 = sphi %s623_s15, %s867_s15   ;;  %s587_s14 = sphi %s621_s14, %s866_s14   ;;  %s583_s13 = sphi %s619_s13, %s865_s13   ;;  %s579_s12 = sphi %s617_s12, %s864_s12  }
   0x4   : > { %s642_s18 = sadd.s32 1, %s591_s15   ;;  %s91_s19 = sadd.s32 1, %s587_s14 }
   0x5   : > { %s88_s20 = ssub.s32 %s591_s15, %s642_s18  ;;  %p101_p0 = scmp.ne.s32.totalorder %s587_s14, %s583_s13 }
   0x6   : > { %p89_p1 = scmp.eq.s32.totalorder %s88_s20, 0  ;;  %p102_p2 = scmp.eq.s32.totalorder %s638_s16, 1 }
   0x7   : > { %p107_p3 = scmp.ne.s32.totalorder %s583_s13, %s579_s12  ;;  %p108_p4 = scmp.eq.s32.totalorder %s414_s17, 1 }
   0x8   : > { %s653_s21 = scalar_select %p89_p1, %s587_s14, %s91_s19  }
   0x9   : > { %p655_p5 = por %p102_p2, %p101_p0  ;;  %p659_p6 = por %p108_p4, %p107_p3 }
   0xa   : > { %p417_p7 = scmp.ge.s32.totalorder %s591_s15, 1  ;;  %p142_p8 = scmp.lt.s32.totalorder %s591_s15, 3 }
   0xc   : > { %p143_p9 = pnand %p417_p7, %p142_p8 }
   0xd   : > { %s419_s11 = sshll.u32 (!%p143_p9), %s638_s16, 1  ;;  %s164_s27 = sand.u32 (!%p143_p9), 1, %s583_s13  }
   0xe   : > { %146 = sbr.rel (%p143_p9) target bundleno = 591 (0x24f), region = 32  ;;  %p168_p10 = scmp.lt.s32.totalorder (!%p143_p9), %s419_s11, 3 }
   0xf   : > { %s418_s30 = sshll.u32 (!%p143_p9), %s164_s27, 4  ;;  %s434_s6 = sshll.u32 (!%p143_p9), %s638_s16, 8 }
  0x10   : > { %s166_s7 = scalar_lea.vmem (!%p143_p9), [#allocation2], %s418_s30  ;;  %s818_s17 = scalar_lea.sflag (!%p143_p9), [#allocation3], %s164_s27 }
  0x11   : > { %s352_s8 = sshll.u32 (!%p143_p9), %s166_s7, 4  ;;  %s594_s19 = smov (!%p143_p9), [#allocation2]   ;;  %s815_s8 = int_to_ptr.vmem [resolvable:$true] %s352_s8 }
  0x12   : > { %s531_s16 = scalar_lea.vmem (!%p143_p9), %s815_s8, 256  ;;  %s535_s20 = sshll.u32 (!%p143_p9), %s594_s19, 4  ;;  %s536_s20 = int_to_ptr.vmem [resolvable:$false] %s535_s20 }
  0x13   : > { %v194_v0 = vld [vmem:[%s859_s1 + $0x78] sm:$0xff]  ;;  %v593_v1 = vmov 0.0   ;;  %v193_v2 = vld [vmem:[%s859_s1 + $0x70] sm:$0xff]  ;;  %v192_v3 = vld [vmem:[%s859_s1 + $0x68] sm:$0xff]  ;;  %vm218_vm0 = vcmask 1043456   ;;  %s869_s11 = smov (!%p168_p10, %s419_s11), 3  ;;  %p532_p11 = scmp.ne.s32.totalorder %s815_s8, %s531_s16 }
  0x14   : > { %222 = vmatprep.subr.mxu0 %v593_v1  ;;  %435 = vmatprep.subr.mxu1 %v593_v1  ;;  %v191_v4 = vld [vmem:[%s859_s1 + $0x60] sm:$0xff]  ;;  %v190_v5 = vld [vmem:[%s859_s1 + $0x58] sm:$0xff]  ;;  %v189_v6 = vld [vmem:[%s859_s1 + $0x50] sm:$0xff]  ;;  %s433_s4 = sshll.u32 %s869_s11, 4  ;;  %vm211_vm1 = vcmask 556032   ;;  %vm297_vm2 = vcmask 261120   ;;  %p538_p0 = scmp.lt.s32.totalorder %s815_s8, %s536_s20 }
  0x15   : > { %223 = vmatpush1.msra.mxu0 %v194_v0  ;;  %460 = vmatpush1.msra.mxu1 %v194_v0  ;;  %v188_v7 = vld [vmem:[%s859_s1 + $0x48] sm:$0xff]  ;;  %v187_v8 = vld [vmem:[%s859_s1 + $0x40] sm:$0xff]  ;;  %v186_v9 = vld [vmem:[%s859_s1 + $0x38] sm:$0xff]  ;;  %s172_s11 = scalar_lea.vmem %s858_s0, %s433_s4  ;;  %p533_p12 = pnand %p532_p11, %p655_p5 }
  0x16   : > { %224 = vmatprep.subr.mxu0 %v593_v1  ;;  %436 = vmatprep.subr.mxu1 %v593_v1  ;;  %v185_v10 = vld [vmem:[%s859_s1 + $0x30] sm:$0xff]  ;;  %v184_v11 = vld [vmem:[%s859_s1 + $0x28] sm:$0xff]  ;;  %v183_v12 = vld [vmem:[%s859_s1 + $0x20] sm:$0xff]  ;;  %s537_s24 = scalar_lea.vmem %s536_s20, 512 }
  0x17   : > { %225 = vmatpush1.msra.mxu0 %v193_v2  ;;  %461 = vmatpush1.msra.mxu1 %v193_v2  ;;  %v182_v13 = vld [vmem:[%s859_s1 + $0x18] sm:$0xff]  ;;  %v181_v14 = vld [vmem:[%s859_s1 + $0x10] sm:$0xff]  ;;  %v180_v15 = vld [vmem:[%s859_s1 + $0x8] sm:$0xff]  ;;  %p534_p13 = pneg %p533_p12  ;;  %p539_p1 = scmp.lt.s32.totalorder %s537_s24, %s531_s16 }
  0x18   : > { %226 = vmatprep.subr.mxu0 %v593_v1  ;;  %437 = vmatprep.subr.mxu1 %v593_v1  ;;  %v179_v16 = vld [vmem:[%s859_s1] sm:$0xff]  ;;  %v202_v18 = vld [vmem:[%s859_s1 + $0xb8] sm:$0xff]  ;;  %v201_v19 = vld [vmem:[%s859_s1 + $0xb0] sm:$0xff] }
  0x19   : > { %227 = vmatpush1.msra.mxu0 %v192_v3  ;;  %462 = vmatpush1.msra.mxu1 %v192_v3  ;;  %v203_v17 = vld [vmem:[%s859_s1 + $0xc0] sm:$0xf]  ;;  %v200_v20 = vld [vmem:[%s859_s1 + $0xa8] sm:$0xff]  ;;  %v198_v22 = vld [vmem:[%s859_s1 + $0x98] sm:$0xff]  ;;  %p540_p2 = por %p539_p1, %p538_p0 }
  0x1a   : > { %228 = vmatprep.subr.mxu0 %v593_v1  ;;  %438 = vmatprep.subr.mxu1 %v593_v1  ;;  %v199_v21 = vld [vmem:[%s859_s1 + $0xa0] sm:$0xff]  ;;  %v197_v23 = vld [vmem:[%s859_s1 + $0x90] sm:$0xff]  ;;  %v196_v24 = vld [vmem:[%s859_s1 + $0x88] sm:$0xff] }
  0x1b   : > { %229 = vmatpush1.msra.mxu0 %v191_v4  ;;  %463 = vmatpush1.msra.mxu1 %v191_v4  ;;  %v176_v25 = vld [vmem:[%s172_s11 + $0x8] sm:$0xff]  ;;  %v195_v26 = vld [vmem:[%s859_s1 + $0x80] sm:$0xff]  ;;  %v178_v28 = vld [vmem:[%s172_s11 + $0x18] sm:$0xff]  ;;  %p541_p3 = pnand %p540_p2, %p534_p13 }
  0x1c   : > { %230 = vmatprep.subr.mxu0 %v593_v1  ;;  %439 = vmatprep.subr.mxu1 %v593_v1  ;;  %v175_v27 = vld [vmem:[%s172_s11] sm:$0xff]  ;;  %v177_v29 = vld [vmem:[%s172_s11 + $0x10] sm:$0xff]  ;;  %s813_s11 = scalar_lea.hbm %s861_s3, %s434_s6 }
  0x1d   : > { %231 = vmatpush1.msra.mxu0 %v190_v5  ;;  %464 = vmatpush1.msra.mxu1 %v190_v5  ;;  %v422_v30 = vld [vmem:[%s860_s2] ss:$0 sm:$0xff]  ;;  %v426_v56 = vld [vmem:[%s860_s2 + $0x1] ss:$0 sm:$0xff]  ;;  %v427_v58 = vld [vmem:[%s860_s2 + $0x2] ss:$0 sm:$0xff] }
  0x1e   : > { %232 = vmatprep.subr.mxu0 %v593_v1  ;;  %440 = vmatprep.subr.mxu1 %v593_v1 }
  0x1f   : > { %233 = vmatpush1.msra.mxu0 %v189_v6  ;;  %465 = vmatpush1.msra.mxu1 %v189_v6 }
  0x20   : > { %234 = vmatprep.subr.mxu0 %v593_v1  ;;  %441 = vmatprep.subr.mxu1 %v593_v1 }
  0x21   : > { %235 = vmatpush1.msra.mxu0 %v188_v7  ;;  %466 = vmatpush1.msra.mxu1 %v188_v7 }
  0x22   : > { %236 = vmatprep.subr.mxu0 %v593_v1  ;;  %442 = vmatprep.subr.mxu1 %v593_v1 }
  0x23   : > { %237 = vmatpush1.msra.mxu0 %v187_v8  ;;  %467 = vmatpush1.msra.mxu1 %v187_v8 }
  0x24   : > { %238 = vmatprep.subr.mxu0 %v593_v1  ;;  %443 = vmatprep.subr.mxu1 %v593_v1 }
  0x25   : > { %239 = vmatpush1.msra.mxu0 %v186_v9  ;;  %468 = vmatpush1.msra.mxu1 %v186_v9 }
  0x26   : > { %240 = vmatprep.subr.mxu0 %v593_v1  ;;  %444 = vmatprep.subr.mxu1 %v593_v1 }
  0x27   : > { %241 = vmatpush1.msra.mxu0 %v185_v10  ;;  %469 = vmatpush1.msra.mxu1 %v185_v10 }
  0x28   : > { %242 = vmatprep.subr.mxu0 %v593_v1  ;;  %445 = vmatprep.subr.mxu1 %v593_v1 }
  0x29   : > { %243 = vmatpush1.msra.mxu0 %v184_v11  ;;  %470 = vmatpush1.msra.mxu1 %v184_v11 }
  0x2a   : > { %244 = vmatprep.subr.mxu0 %v593_v1  ;;  %446 = vmatprep.subr.mxu1 %v593_v1 }
  0x2b   : > { %245 = vmatpush1.msra.mxu0 %v183_v12  ;;  %471 = vmatpush1.msra.mxu1 %v183_v12 }
  0x2c   : > { %246 = vmatprep.subr.mxu0 %v593_v1  ;;  %447 = vmatprep.subr.mxu1 %v593_v1 }
  0x2d   : > { %247 = vmatpush1.msra.mxu0 %v182_v13  ;;  %472 = vmatpush1.msra.mxu1 %v182_v13 }
  0x2e   : > { %248 = vmatprep.subr.mxu0 %v593_v1  ;;  %448 = vmatprep.subr.mxu1 %v593_v1 }
  0x2f   : > { %249 = vmatpush1.msra.mxu0 %v181_v14  ;;  %473 = vmatpush1.msra.mxu1 %v181_v14 }
  0x30   : > { %250 = vmatprep.subr.mxu0 %v593_v1  ;;  %449 = vmatprep.subr.mxu1 %v593_v1 }
  0x31   : > { %251 = vmatpush1.msra.mxu0 %v180_v15  ;;  %474 = vmatpush1.msra.mxu1 %v180_v15 }
  0x32   : > { %252 = vmatprep.subr.mxu0 %v593_v1  ;;  %450 = vmatprep.subr.mxu1 %v593_v1 }
  0x33   : > { %253 = vmatpush1.msra.mxu0 %v179_v16  ;;  %475 = vmatpush1.msra.mxu1 %v179_v16 }
  0x34   : > { %268 = vmatprep.subr.mxu0 %v593_v1  ;;  %451 = vmatprep.subr.mxu1 %v593_v1 }
  0x35   : > { %423 = vmatpush2.msk.msra.mxu0 %vm218_vm0, %v203_v17  ;;  %476 = vmatpush2.msk.msra.mxu1 %vm218_vm0, %v203_v17 }
  0x36   : > { %270 = vmatprep.subr.mxu0 %v593_v1  ;;  %452 = vmatprep.subr.mxu1 %v593_v1 }
  0x37   : > { %271 = vmatpush2.msra.mxu0 %v202_v18  ;;  %477 = vmatpush2.msra.mxu1 %v202_v18 }
  0x38   : > { %272 = vmatprep.subr.mxu0 %v593_v1  ;;  %453 = vmatprep.subr.mxu1 %v593_v1 }
  0x39   : > { %273 = vmatpush2.msra.mxu0 %v201_v19  ;;  %478 = vmatpush2.msra.mxu1 %v201_v19 }
  0x3a   : > { %274 = vmatprep.subr.mxu0 %v593_v1  ;;  %454 = vmatprep.subr.mxu1 %v593_v1 }
  0x3b   : > { %275 = vmatpush2.msra.mxu0 %v200_v20  ;;  %479 = vmatpush2.msra.mxu1 %v200_v20 }
  0x3c   : > { %276 = vmatprep.subr.mxu0 %v593_v1  ;;  %455 = vmatprep.subr.mxu1 %v593_v1 }
  0x3d   : > { %277 = vmatpush2.msra.mxu0 %v199_v21  ;;  %480 = vmatpush2.msra.mxu1 %v199_v21 }
  0x3e   : > { %278 = vmatprep.subr.mxu0 %v593_v1  ;;  %456 = vmatprep.subr.mxu1 %v593_v1 }
  0x3f   : > { %279 = vmatpush2.msra.mxu0 %v198_v22  ;;  %481 = vmatpush2.msra.mxu1 %v198_v22 }
  0x40   : > { %280 = vmatprep.subr.mxu0 %v593_v1  ;;  %457 = vmatprep.subr.mxu1 %v593_v1 }
  0x41   : > { %281 = vmatpush2.msra.mxu0 %v197_v23  ;;  %482 = vmatpush2.msra.mxu1 %v197_v23 }
  0x42   : > { %282 = vmatprep.subr.mxu0 %v593_v1  ;;  %458 = vmatprep.subr.mxu1 %v593_v1 }
  0x43   : > { %283 = vmatpush2.msra.mxu0 %v196_v24  ;;  %483 = vmatpush2.msra.mxu1 %v196_v24 }
  0x44   : > { %284 = vmatprep.subr.mxu0 %v593_v1  ;;  %424 = vmatprep.mubr.msk.f32.mxu0 %vm211_vm1, %v176_v25 }
  0x45   : > { %285 = vmatpush2.msra.mxu0 %v195_v26  ;;  %459 = vmatprep.subr.mxu1 %v593_v1 }
  0x46   : > { %287 = vmatmul.mubr.f32.vlgmr.msra.gmra.mxu0 %v175_v27  ;;  %484 = vmatpush2.msra.mxu1 %v195_v26 }
  0x47   : > { %425 = vmatprep.mubr.msk.f32.mxu1 %vm211_vm1, %v178_v28 }
  0x48   : > { %292 = vmatmul.mubr.f32.vlgmr.msra.gmra.mxu1 %v177_v29 }
 0x106   : > { %v288_v31 = vpop.f32.mrf.mxu0 }
 0x107   : > { %v289_v32 = vadd.f32 %v422_v30, %v288_v31 }
 0x108   : > { %v290_v33 = vpop.f32.mrf.mxu0  ;;  %v293_v34 = vpop.f32.mrf.mxu1 }
 0x109   : > { %v294_v35 = vadd.f32 %v422_v30, %v293_v34  ;;  %v298_v36 = vsel %vm297_vm2, %v289_v32, 0.0 }
 0x10a   : > { %v295_v37 = vpop.f32.mrf.mxu1  ;;  %299 = vadd.xlane.f32.xlu0 %v298_v36 }
 0x10b   : > { %v301_v38 = vsel %vm297_vm2, %v294_v35, 0.0 }
 0x10e   : > { %302 = vadd.xlane.f32.xlu0 %v301_v38 }
 0x193   : > { %v300_v39 = vpop.xlane.xlu0 %299 }
 0x194   : > { %v304_v40 = vmul.f32 0.03125, %v300_v39 }
 0x196   : > { %v306_v41 = vsub.f32 %v289_v32, %v304_v40 }
 0x197   : > { %v303_v42 = vpop.xlane.xlu0 %302 }
 0x198   : > { %v305_v43 = vmul.f32 0.03125, %v303_v42  ;;  %v308_v44 = vmul.f32 %v306_v41, %v306_v41 }
 0x19a   : > { %v307_v45 = vsub.f32 %v294_v35, %v305_v43  ;;  %v310_v46 = vsel %vm297_vm2, %v308_v44, 0.0 }
 0x19b   : > { %311 = vadd.xlane.f32.xlu1 %v310_v46 }
 0x19c   : > { %v309_v47 = vmul.f32 %v307_v45, %v307_v45 }
 0x19e   : > { %v313_v48 = vsel %vm297_vm2, %v309_v47, 0.0 }
 0x19f   : > { %314 = vadd.xlane.f32.xlu1 %v313_v48 }
 0x224   : > { %v312_v49 = vpop.xlane.xlu1 %311 }
 0x225   : > { %v316_v50 = vmul.f32 0.03125, %v312_v49 }
 0x227   : > { %v318_v51 = vadd.f32 1e-05, %v316_v50 }
 0x228   : > { %v315_v52 = vpop.xlane.xlu1 %314 }
 0x229   : > { %527 = vrsqrt.f32 %v318_v51  ;;  %v317_v53 = vmul.f32 0.03125, %v315_v52 }
 0x22b   : > { %v319_v54 = vadd.f32 1e-05, %v317_v53 }
 0x22d   : > { %529 = vrsqrt.f32 %v319_v54 }
 0x236   : > { %v528_v55 = vpop.eup %527 }
 0x237   : > { %v322_v57 = vmul.f32 %v528_v55, %v306_v41 }
 0x239   : > { %v328_v59 = vmul.f32 %v426_v56, %v322_v57 }
 0x23a   : > { %v530_v60 = vpop.eup %529 }
 0x23b   : > { %v323_v61 = vmul.f32 %v530_v60, %v307_v45  ;;  %v334_v62 = vadd.f32 %v427_v58, %v328_v59 }
 0x23d   : > { %v329_v63 = vmul.f32 %v426_v56, %v323_v61  ;;  %336 = vst.msk [vmem:[%s166_s7] sm:$0xff] %vm297_vm2, %v334_v62 }
 0x23f   : > { %v335_v0 = vadd.f32 %v427_v58, %v329_v63 }
 0x241   : > { %337 = vst.msk [vmem:[%s166_s7 + $0x8] sm:$0xff] %vm297_vm2, %v335_v0 }
 0x242   : > { %544 = shalt.err (!%p541_p3)
}
 0x243   : > { %s545_s25 = scalar_lea.hbm %s813_s11, 256  ;;  %s549_s28 = scalar_lea.hbm %s861_s3, 512 }
 0x244   : > { %p546_p4 = scmp.ne.s32.totalorder %s813_s11, %s545_s25  ;;  %p550_p9 = scmp.lt.s32.totalorder %s813_s11, %s861_s3 }
 0x245   : > { %p551_p10 = scmp.lt.s32.totalorder %s549_s28, %s545_s25 }
 0x246   : > { %p547_p7 = pnand %p546_p4, %p655_p5 }
 0x247   : > { %p552_p11 = por %p551_p10, %p550_p9 }
 0x248   : > { %p548_p8 = pneg %p547_p7 }
 0x24a   : > { %p553_p12 = pnand %p552_p11, %p548_p8 }
 0x24c   : > { %556 = shalt.err (!%p553_p12)
}
 0x24d   : > { %s595_s4 = smov 128   ;;  %s596_s5 = smov 8  }
 0x24e   : > { %485 = dma.vmem_to_hbm [thread:$0]  (%p655_p5), %s815_s8, 256, %s813_s11, %s818_s17, %s595_s4, %s595_s4, %s596_s5  }
 0x24f PF: > { %p491_p13 = scmp.ge.s32.totalorder %s591_s15, 2  ;;  %s367_s6 = sand.u32 1, %s579_s12  }
 0x250   : > { %s368_s7 = scalar_lea.sflag [#allocation3], %s367_s6 }
 0x251   : > { %p488_p0 = pnand %p491_p13, %p659_p6 }
 0x253   : > { %p489_p1 = pneg %p488_p0 }
 0x255   : > { %574 = dma.done.wait (%p489_p1), %s368_s7, 256  }
 0x256   : > { %576 = vsyncadd (%p489_p1), %s368_s7, 4294967040  ;;  %p13_p2 = scmp.ge.s32.totalorder %s642_s18, 4   ;;  %s864_s12 = smov %s583_s13 }
 0x257   : > { %s865_s13 = smov %s587_s14  ;;  %s866_s14 = smov %s653_s21 }
 0x258   : > { %s867_s15 = smov %s642_s18  ;;  %15 = sbr.rel (!%p13_p2) target bundleno = 3 (0x3), region = 67 }
 0x25d   :  { %373 = vsyncpa [#allocation3], 1 }
 0x25e   :  { %375 = vsyncpa [#allocation3 + $0x1], 1 }

</bundles_post_ra>
